<compile_context>
chip_gen: v7x
topology: tpu7x:2x2x1
jax: 0.10.0
libtpu: 0.0.40
codegen_flags: <defaults>
</compile_context>

<pallas_src>
import functools

import numpy as np
import jax
import jax.numpy as jnp
from jax.experimental import pallas as pl
from jax.experimental.pallas import tpu as pltpu

# ---- synthetic BC3 sub-module dimensions -----------------------------------
LIDAR_LEN = 64                      # lidar beams
C1, K1, S1, P1 = 8, 4, 2, 1         # conv1: Conv1d(1 -> 8, k=4, stride=2, pad=1)
T1 = (LIDAR_LEN + 2 * P1 - K1) // S1 + 1        # 32
C2, K2 = 16, 3                      # conv2: Conv1d(8 -> 16, k=3, stride=1, valid)
T2 = T1 - K2 + 1                    # 30
Z_DIM = 32                          # unet_encoder latent z
E_DIM = 32                          # traj_embed output
H_DIM = 64                          # head hidden width
N_WAY = 8                           # predicted waypoints
OUT_DIM = 2 * N_WAY                 # 16
N_PAST = 4                          # past trajectory points (x, y each)
GOAL_DIM = 2
TRAJ_PAD = 16                       # traj input zero-padded to a fixed 16 lanes

# ---- packed parameter slab layout (bf16, grouped by lane width) -------------
# slab A (lanes=256): conv1 Toeplitz + broadcast bias
A_W1_ROW, A_B1_ROW = 0, LIDAR_LEN
A_ROWS, A_LANES = 80, T1 * C1                     # (80, 256)
# slab B (lanes=512): conv2 Toeplitz + broadcast bias, lanes 480..511 zero-pad
CONV2_LANES = 512
B_W2_ROW, B_B2_ROW = 0, T1 * C1
B_ROWS, B_LANES = 272, CONV2_LANES                # (272, 512)
# slab C (lanes=64): fused [bottleneck | traj-embed] block weights, head, biases
C_WZE_ROW = 0                                     # (512, 64): tiled wz in cols 0..31
C_WTE_ROW = C_WZE_ROW + CONV2_LANES               # 512: (16, 64): we in cols 32..63
C_WH1_ROW = C_WTE_ROW + TRAJ_PAD                  # 528: (64, 64): stacked [wh1a; wh1b]
C_WH2_ROW = C_WH1_ROW + H_DIM                     # 592: (64, 16) head output layer
C_BZE_ROW = C_WH2_ROW + H_DIM                     # 656: [bz | be]
C_BH1_ROW = C_BZE_ROW + 1                         # 657
C_BH2_ROW = C_BZE_ROW + 2                         # 658
C_ROWS, C_LANES = 672, Z_DIM + E_DIM              # (672, 64)


def _elementwise_dtype():
    """bf16 bias/ReLU path on v6e/v7x (native bf16 VPU); f32 on v5e and older."""
    try:
        kind = jax.devices()[0].device_kind.lower()
    except Exception:
        return jnp.float32
    if any(tag in kind for tag in ("v6", "v7", "7x")):
        return jnp.bfloat16
    return jnp.float32


def _pick_batch_tile(B):
    """512 rows: multiple of 128 (v5e MXU) and 256 (v6e/v7x MXU), near the
    tiling-sweep roofline sweet spot, and small enough to double-buffer inside
    v7x's 64 MiB VMEM. Small batches collapse to one sublane-aligned tile."""
    if B >= 512:
        return 512
    return ((B + 7) // 8) * 8


def _bc3_kernel(x_ref, traj_ref, a_ref, b_ref, c_ref, out_ref, *, elem_dtype):
    """Fully fused forward pass for one batch tile: conv encoder + traj embed
    + head, all on the MXU, no in-kernel concats."""
    f32, bf16 = jnp.float32, jnp.bfloat16
    ed = elem_dtype

    # --- conv1 as one batched dense (Toeplitz) matmul -------------------------
    x = x_ref[...].astype(bf16)                                        # (TB, 64)
    w1t = a_ref[A_W1_ROW:A_W1_ROW + LIDAR_LEN, :]                      # (64, 256) bf16
    b1 = a_ref[A_B1_ROW:A_B1_ROW + 1, :].astype(ed)                    # (1, 256)
    h1 = jnp.maximum(
        jnp.dot(x, w1t, preferred_element_type=f32).astype(ed) + b1, 0.0)   # (TB, 256)

    # --- conv2 as one batched dense (Toeplitz) matmul, 512 padded lanes -------
    w2t = b_ref[B_W2_ROW:B_W2_ROW + T1 * C1, :]                        # (256, 512) bf16
    b2 = b_ref[B_B2_ROW:B_B2_ROW + 1, :].astype(ed)                    # (1, 512)
    h2 = jnp.maximum(
        jnp.dot(h1.astype(bf16), w2t, preferred_element_type=f32).astype(ed) + b2,
        0.0)                                                           # (TB, 512); lanes 480.. are 0

    # --- fused bottleneck(+mean-pool) | traj-embed -> [z | tg] in lanes 0..63 --
    # Both dots accumulate into the same (TB, 64) f32 result: no lane concat,
    # one bias add, one ReLU. The 1/T2 mean-pool scale is applied in f32.
    tg_in = traj_ref[...].astype(bf16)                                 # (TB, 16)
    w_ze = c_ref[C_WZE_ROW:C_WZE_ROW + CONV2_LANES, :]                 # (512, 64) bf16
    w_te = c_ref[C_WTE_ROW:C_WTE_ROW + TRAJ_PAD, :]                    # (16, 64) bf16
    b_ze = c_ref[C_BZE_ROW:C_BZE_ROW + 1, :].astype(f32)               # (1, 64) = [bz|be]
    zt = jnp.maximum(
        jnp.dot(h2.astype(bf16), w_ze, preferred_element_type=f32) * (1.0 / T2)
        + jnp.dot(tg_in, w_te, preferred_element_type=f32)
        + b_ze, 0.0)                                                   # (TB, 64) = [z | tg]

    # --- head layer 1 ----------------------------------------------------------
    wh1 = c_ref[C_WH1_ROW:C_WH1_ROW + H_DIM, :]                        # (64, 64) bf16
    bh1 = c_ref[C_BH1_ROW:C_BH1_ROW + 1, :].astype(f32)
    h3 = jnp.maximum(
        jnp.dot(zt.astype(bf16), wh1, preferred_element_type=f32) + bh1, 0.0)  # (TB, 64)

    # --- head layer 2 -> trajectory --------------------------------------------
    wh2 = c_ref[C_WH2_ROW:C_WH2_ROW + H_DIM, 0:OUT_DIM]                # (64, 16) bf16
    bh2 = c_ref[C_BH2_ROW:C_BH2_ROW + 1, 0:OUT_DIM].astype(f32)
    out_ref[...] = (jnp.dot(h3.astype(bf16), wh2, preferred_element_type=f32)
                    + bh2).astype(out_ref.dtype)


def init_params(exp_num, key):
    """Deterministic synthetic parameters (PyTorch-style uniform(-1/sqrt(fan_in)))."""
    keys = jax.random.split(key, 13)

    def lin(k, fan_in, shape):
        bound = 1.0 / float(fan_in) ** 0.5
        return jax.random.uniform(k, shape, jnp.float32, -bound, bound)

    traj_in = N_PAST * 2 + GOAL_DIM if exp_num in (1, 2) else GOAL_DIM
    return dict(
        w1=lin(keys[0], K1, (K1, C1)),                b1=lin(keys[1], K1, (1, C1)),
        w2=lin(keys[2], K2 * C1, (K2 * C1, C2)),      b2=lin(keys[3], K2 * C1, (1, C2)),
        wz=lin(keys[4], C2, (C2, Z_DIM)),             bz=lin(keys[5], C2, (1, Z_DIM)),
        we=lin(keys[6], traj_in, (traj_in, E_DIM)),   be=lin(keys[7], traj_in, (1, E_DIM)),
        wh1a=lin(keys[8], Z_DIM + E_DIM, (Z_DIM, H_DIM)),
        wh1b=lin(keys[9], Z_DIM + E_DIM, (E_DIM, H_DIM)),
        bh1=lin(keys[10], Z_DIM + E_DIM, (1, H_DIM)),
        wh2=lin(keys[11], H_DIM, (H_DIM, OUT_DIM)),   bh2=lin(keys[12], H_DIM, (1, OUT_DIM)),
    )


def pack_params(params):
    """One-time host-side packing: convs -> Toeplitz matmuls, everything -> 3 bf16 slabs."""
    w1 = np.asarray(params["w1"], np.float32)
    b1 = np.asarray(params["b1"], np.float32).reshape(C1)
    w2 = np.asarray(params["w2"], np.float32)
    b2 = np.asarray(params["b2"], np.float32).reshape(C2)
    wz = np.asarray(params["wz"], np.float32)
    bz = np.asarray(params["bz"], np.float32).reshape(Z_DIM)
    we = np.asarray(params["we"], np.float32)
    be = np.asarray(params["be"], np.float32).reshape(E_DIM)
    wh1 = np.concatenate([np.asarray(params["wh1a"], np.float32),
                          np.asarray(params["wh1b"], np.float32)], axis=0)   # (64, 64)
    bh1 = np.asarray(params["bh1"], np.float32).reshape(H_DIM)
    wh2 = np.asarray(params["wh2"], np.float32)
    bh2 = np.asarray(params["bh2"], np.float32).reshape(OUT_DIM)

    # conv1 (pad=1, stride=2, k=4) as a Toeplitz matrix: x(B,64) @ w1t -> (B, T1*C1)
    w1t = np.zeros((LIDAR_LEN, T1 * C1), np.float32)
    for t in range(T1):
        for k in range(K1):
            i = t * S1 + k - P1
            if 0 <= i < LIDAR_LEN:
                w1t[i, t * C1:(t + 1) * C1] = w1[k, :]
    b1_bcast = np.tile(b1, T1)

    # conv2 (k=3, stride=1, valid) as a Toeplitz matrix, lanes padded 480 -> 512
    w2t = np.zeros((T1 * C1, CONV2_LANES), np.float32)
    for t2 in range(T2):
        for k in range(K2):
            t1 = t2 + k
            w2t[t1 * C1:(t1 + 1) * C1, t2 * C2:(t2 + 1) * C2] = w2[k * C1:(k + 1) * C1, :]
    b2_bcast = np.zeros((CONV2_LANES,), np.float32)
    b2_bcast[:T2 * C2] = np.tile(b2, T2)

    slab_a = np.zeros((A_ROWS, A_LANES), np.float32)
    slab_a[A_W1_ROW:A_W1_ROW + LIDAR_LEN] = w1t
    slab_a[A_B1_ROW] = b1_bcast

    slab_b = np.zeros((B_ROWS, B_LANES), np.float32)
    slab_b[B_W2_ROW:B_W2_ROW + T1 * C1] = w2t
    slab_b[B_B2_ROW] = b2_bcast

    slab_c = np.zeros((C_ROWS, C_LANES), np.float32)
    # mean-pool folded as time-tiled wz; the 1/T2 scale is applied in-kernel in f32.
    slab_c[C_WZE_ROW:C_WZE_ROW + T2 * C2, :Z_DIM] = np.tile(wz, (T2, 1))
    slab_c[C_WTE_ROW:C_WTE_ROW + we.shape[0], Z_DIM:Z_DIM + E_DIM] = we
    slab_c[C_WH1_ROW:C_WH1_ROW + Z_DIM + E_DIM, :H_DIM] = wh1
    slab_c[C_WH2_ROW:C_WH2_ROW + H_DIM, :OUT_DIM] = wh2
    slab_c[C_BZE_ROW, :Z_DIM] = bz
    slab_c[C_BZE_ROW, Z_DIM:Z_DIM + E_DIM] = be
    slab_c[C_BH1_ROW, :H_DIM] = bh1
    slab_c[C_BH2_ROW, :OUT_DIM] = bh2

    return dict(slab_a=jnp.asarray(slab_a, jnp.bfloat16),
                slab_b=jnp.asarray(slab_b, jnp.bfloat16),
                slab_c=jnp.asarray(slab_c, jnp.bfloat16))


@functools.partial(jax.jit, static_argnames=("exp_num", "batch_tile"))
def bc3_ported_forward(packed, lidar_scans, goal, past_traj, exp_num=1, batch_tile=None):
    """Batch-tiled fused pallas_call; weight slabs stay VMEM-resident across tiles."""
    if exp_num not in (1, 2, 3):
        raise ValueError("exp_num must be in {1, 2, 3}")
    B = lidar_scans.shape[0]
    x = lidar_scans.reshape(B, LIDAR_LEN).astype(jnp.float32)     # (B, 1, L) NCL -> (B, L)

    # Hoisted past/goal concat + zero-pad to a fixed 16-lane traj input
    # (kernel body is exp_num-invariant; unused weight rows are zero).
    if exp_num in (1, 2):
        tg = jnp.concatenate([past_traj.astype(jnp.float32),
                              goal.astype(jnp.float32)], axis=1)  # (B, 10)
    else:
        tg = goal.astype(jnp.float32)                             # (B, 2)
    tg16 = jnp.pad(tg, ((0, 0), (0, TRAJ_PAD - tg.shape[1])))     # (B, 16)

    TB = batch_tile if batch_tile is not None else _pick_batch_tile(B)
    if TB % 8 != 0 or TB <= 0:
        raise ValueError("batch_tile must be a positive multiple of 8")
    Bp = ((B + TB - 1) // TB) * TB
    if Bp != B:
        x = jnp.pad(x, ((0, Bp - B), (0, 0)))
        tg16 = jnp.pad(tg16, ((0, Bp - B), (0, 0)))

    grid = (Bp // TB,)
    flops = 2 * Bp * (LIDAR_LEN * A_LANES + (T1 * C1) * B_LANES
                      + CONV2_LANES * (Z_DIM + E_DIM) + TRAJ_PAD * (Z_DIM + E_DIM)
                      + H_DIM * H_DIM + H_DIM * OUT_DIM)
    bytes_accessed = (4 * (x.size + tg16.size + Bp * OUT_DIM)
                      + 2 * (A_ROWS * A_LANES + B_ROWS * B_LANES + C_ROWS * C_LANES))

    out = pl.pallas_call(
        functools.partial(_bc3_kernel, elem_dtype=_elementwise_dtype()),
        out_shape=jax.ShapeDtypeStruct((Bp, OUT_DIM), jnp.float32),
        grid=grid,
        in_specs=[
            pl.BlockSpec((TB, LIDAR_LEN), lambda i: (i, 0)),       # lidar tile
            pl.BlockSpec((TB, TRAJ_PAD), lambda i: (i, 0)),        # traj tile
            pl.BlockSpec((A_ROWS, A_LANES), lambda i: (0, 0)),     # resident weights
            pl.BlockSpec((B_ROWS, B_LANES), lambda i: (0, 0)),     # resident weights
            pl.BlockSpec((C_ROWS, C_LANES), lambda i: (0, 0)),     # resident weights
        ],
        out_specs=pl.BlockSpec((TB, OUT_DIM), lambda i: (i, 0)),
        compiler_params=pltpu.CompilerParams(
            dimension_semantics=("parallel",),
            vmem_limit_bytes=32 * 1024 * 1024),
        cost_estimate=pl.CostEstimate(flops=int(flops), transcendentals=0,
                                      bytes_accessed=int(bytes_accessed)),
    )(x, tg16, packed["slab_a"], packed["slab_b"], packed["slab_c"])

    return out[:B] if Bp != B else out


def _ref_forward(params, lidar_scans, goal, past_traj, exp_num):
    """Pure-JAX reference emulating the kernel's bf16-operand / f32-accumulate policy."""
    f32 = jnp.float32
    bf = lambda a: a.astype(jnp.bfloat16)
    x = lidar_scans[:, 0, :].astype(f32)
    xp = jnp.pad(x, ((0, 0), (P1, P1)))
    idx = S1 * jnp.arange(T1)[:, None] + jnp.arange(K1)[None, :]
    patches = xp[:, idx]                                              # (B, T1, K1)
    h1 = jnp.maximum(jnp.einsum("btk,kc->btc", bf(patches), bf(params["w1"]),
                                preferred_element_type=f32) + params["b1"], 0.0)
    h1b = bf(h1)
    acc = jnp.zeros((x.shape[0], T2, C2), f32)
    for k in range(K2):
        acc = acc + jnp.einsum("btc,cd->btd", h1b[:, k:k + T2, :],
                               bf(params["w2"][k * C1:(k + 1) * C1, :]),
                               preferred_element_type=f32)
    h2 = jnp.maximum(acc + params["b2"], 0.0)
    z_pool = jnp.mean(h2, axis=1)                                     # (B, C2)
    z = jnp.maximum(jnp.dot(bf(z_pool), bf(params["wz"]),
                            preferred_element_type=f32) + params["bz"], 0.0)
    tg_in = jnp.concatenate([past_traj, goal], axis=1) if exp_num in (1, 2) else goal
    tg = jnp.maximum(jnp.dot(bf(tg_in.astype(f32)), bf(params["we"]),
                             preferred_element_type=f32) + params["be"], 0.0)
    h3 = jnp.maximum(jnp.dot(bf(z), bf(params["wh1a"]), preferred_element_type=f32)
                     + jnp.dot(bf(tg), bf(params["wh1b"]), preferred_element_type=f32)
                     + params["bh1"], 0.0)
    return jnp.dot(bf(h3), bf(params["wh2"]), preferred_element_type=f32) + params["bh2"]


if __name__ == "__main__":
    key = jax.random.PRNGKey(0)
    k1, k2, k3, kp = jax.random.split(key, 4)

    # --- small-batch check (single tile) --------------------------------------
    B = 2
    lidar_scans = jax.random.normal(k1, (B, 1, LIDAR_LEN), jnp.float32)   # NCL
    goal = jax.random.normal(k2, (B, GOAL_DIM), jnp.float32)
    past_traj = jax.random.normal(k3, (B, N_PAST * 2), jnp.float32)

    params = init_params(exp_num=1, key=kp)
    packed = pack_params(params)

    traj = bc3_ported_forward(packed, lidar_scans, goal, past_traj, exp_num=1)
    jax.block_until_ready(traj)
    assert traj.shape == (B, OUT_DIM) and traj.dtype == jnp.float32
    assert bool(jnp.all(jnp.isfinite(traj)))
    ref = _ref_forward(params, lidar_scans, goal, past_traj, 1)
    assert bool(jnp.allclose(traj, ref, atol=5e-2, rtol=5e-2)), "mismatch vs JAX reference"

    # --- multi-tile grid path: remainder padding + pipelined batch grid -------
    B2 = 42
    kl, kg, kt = jax.random.split(jax.random.PRNGKey(1), 3)
    lidar2 = jax.random.normal(kl, (B2, 1, LIDAR_LEN), jnp.float32)
    goal2 = jax.random.normal(kg, (B2, GOAL_DIM), jnp.float32)
    past2 = jax.random.normal(kt, (B2, N_PAST * 2), jnp.float32)
    traj2 = bc3_ported_forward(packed, lidar2, goal2, past2, exp_num=1, batch_tile=16)
    jax.block_until_ready(traj2)
    assert traj2.shape == (B2, OUT_DIM)
    ref2 = _ref_forward(params, lidar2, goal2, past2, 1)
    assert bool(jnp.allclose(traj2, ref2, atol=5e-2, rtol=5e-2)), "grid path mismatch"

    print("KERNEL_OK")
</pallas_src>

<mosaic_0001>
module attributes {stable_mosaic.version = 11 : i64} {
  func.func @_bc3_kernel(%arg0: i32, %arg1: memref<8x64xf32, #tpu.memory_space<vmem>>, %arg2: memref<8x16xf32, #tpu.memory_space<vmem>>, %arg3: memref<80x256xbf16, #tpu.memory_space<vmem>>, %arg4: memref<272x512xbf16, #tpu.memory_space<vmem>>, %arg5: memref<672x64xbf16, #tpu.memory_space<vmem>>, %arg6: memref<8x16xf32, #tpu.memory_space<vmem>>) attributes {dimension_semantics = [#tpu.dimension_semantics<parallel>], iteration_bounds = array<i64: 1>, scalar_prefetch = 0 : i64, scratch_operands = 0 : i64, tpu.core_type = #tpu.core_type<tc>, window_params = [{transform_indices = @transform_0, window_bounds = array<i64: 8, 64>}, {transform_indices = @transform_1, window_bounds = array<i64: 8, 16>}, {pipeline_mode = #tpu.pipeline_mode<synchronous>, transform_indices = @transform_2, window_bounds = array<i64: 80, 256>}, {pipeline_mode = #tpu.pipeline_mode<synchronous>, transform_indices = @transform_3, window_bounds = array<i64: 272, 512>}, {pipeline_mode = #tpu.pipeline_mode<synchronous>, transform_indices = @transform_4, window_bounds = array<i64: 672, 64>}, {transform_indices = @transform_5, window_bounds = array<i64: 8, 16>}]} {
    %c0 = arith.constant 0 : index
    %c0_0 = arith.constant 0 : index
    %0 = vector.load %arg1[%c0, %c0_0] : memref<8x64xf32, #tpu.memory_space<vmem>>, vector<8x64xf32>
    %1 = arith.truncf %0 : vector<8x64xf32> to vector<8x64xbf16>
    %c0_1 = arith.constant 0 : index
    %c0_2 = arith.constant 0 : index
    %2 = vector.load %arg3[%c0_1, %c0_2] : memref<80x256xbf16, #tpu.memory_space<vmem>>, vector<64x256xbf16>
    %c64 = arith.constant 64 : index
    %c0_3 = arith.constant 0 : index
    %3 = vector.load %arg3[%c64, %c0_3] : memref<80x256xbf16, #tpu.memory_space<vmem>>, vector<1x256xbf16>
    %4 = arith.extf %3 : vector<1x256xbf16> to vector<1x256xf32>
    %cst = arith.constant dense<0.000000e+00> : vector<8x256xf32>
    %5 = tpu.matmul %1, %2, %cst {dimension_numbers = #tpu.dot_dimension_numbers<[1], [0], [0], [1], [0, 0, 1, 1], [], []>} : vector<8x64xbf16>, vector<64x256xbf16>, vector<8x256xf32> -> vector<8x256xf32>
    %6 = vector.broadcast %4 : vector<1x256xf32> to vector<8x256xf32>
    %7 = arith.addf %5, %6 : vector<8x256xf32>
    %cst_4 = arith.constant 0.000000e+00 : f32
    %8 = vector.broadcast %cst_4 : f32 to vector<8x256xf32>
    %9 = arith.maximumf %7, %8 : vector<8x256xf32>
    %c0_5 = arith.constant 0 : index
    %c0_6 = arith.constant 0 : index
    %10 = vector.load %arg4[%c0_5, %c0_6] : memref<272x512xbf16, #tpu.memory_space<vmem>>, vector<256x512xbf16>
    %c256 = arith.constant 256 : index
    %c0_7 = arith.constant 0 : index
    %11 = vector.load %arg4[%c256, %c0_7] : memref<272x512xbf16, #tpu.memory_space<vmem>>, vector<1x512xbf16>
    %12 = arith.extf %11 : vector<1x512xbf16> to vector<1x512xf32>
    %13 = arith.truncf %9 : vector<8x256xf32> to vector<8x256xbf16>
    %cst_8 = arith.constant dense<0.000000e+00> : vector<8x512xf32>
    %14 = tpu.matmul %13, %10, %cst_8 {dimension_numbers = #tpu.dot_dimension_numbers<[1], [0], [0], [1], [0, 0, 1, 1], [], []>} : vector<8x256xbf16>, vector<256x512xbf16>, vector<8x512xf32> -> vector<8x512xf32>
    %15 = vector.broadcast %12 : vector<1x512xf32> to vector<8x512xf32>
    %16 = arith.addf %14, %15 : vector<8x512xf32>
    %cst_9 = arith.constant 0.000000e+00 : f32
    %17 = vector.broadcast %cst_9 : f32 to vector<8x512xf32>
    %18 = arith.maximumf %16, %17 : vector<8x512xf32>
    %c0_10 = arith.constant 0 : index
    %c0_11 = arith.constant 0 : index
    %19 = vector.load %arg2[%c0_10, %c0_11] : memref<8x16xf32, #tpu.memory_space<vmem>>, vector<8x16xf32>
    %20 = arith.truncf %19 : vector<8x16xf32> to vector<8x16xbf16>
    %c0_12 = arith.constant 0 : index
    %c0_13 = arith.constant 0 : index
    %21 = vector.load %arg5[%c0_12, %c0_13] : memref<672x64xbf16, #tpu.memory_space<vmem>>, vector<512x64xbf16>
    %c512 = arith.constant 512 : index
    %c0_14 = arith.constant 0 : index
    %22 = vector.load %arg5[%c512, %c0_14] : memref<672x64xbf16, #tpu.memory_space<vmem>>, vector<16x64xbf16>
    %c656 = arith.constant 656 : index
    %c0_15 = arith.constant 0 : index
    %23 = vector.load %arg5[%c656, %c0_15] : memref<672x64xbf16, #tpu.memory_space<vmem>>, vector<1x64xbf16>
    %24 = arith.extf %23 : vector<1x64xbf16> to vector<1x64xf32>
    %25 = arith.truncf %18 : vector<8x512xf32> to vector<8x512xbf16>
    %cst_16 = arith.constant dense<0.000000e+00> : vector<8x64xf32>
    %26 = tpu.matmul %25, %21, %cst_16 {dimension_numbers = #tpu.dot_dimension_numbers<[1], [0], [0], [1], [0, 0, 1, 1], [], []>} : vector<8x512xbf16>, vector<512x64xbf16>, vector<8x64xf32> -> vector<8x64xf32>
    %cst_17 = arith.constant 0.0333333351 : f32
    %27 = vector.broadcast %cst_17 : f32 to vector<8x64xf32>
    %28 = arith.mulf %26, %27 : vector<8x64xf32>
    %cst_18 = arith.constant dense<0.000000e+00> : vector<8x64xf32>
    %29 = tpu.matmul %20, %22, %cst_18 {dimension_numbers = #tpu.dot_dimension_numbers<[1], [0], [0], [1], [0, 0, 1, 1], [], []>} : vector<8x16xbf16>, vector<16x64xbf16>, vector<8x64xf32> -> vector<8x64xf32>
    %30 = arith.addf %28, %29 : vector<8x64xf32>
    %31 = vector.broadcast %24 : vector<1x64xf32> to vector<8x64xf32>
    %32 = arith.addf %30, %31 : vector<8x64xf32>
    %cst_19 = arith.constant 0.000000e+00 : f32
    %33 = vector.broadcast %cst_19 : f32 to vector<8x64xf32>
    %34 = arith.maximumf %32, %33 : vector<8x64xf32>
    %c528 = arith.constant 528 : index
    %c0_20 = arith.constant 0 : index
    %35 = vector.load %arg5[%c528, %c0_20] : memref<672x64xbf16, #tpu.memory_space<vmem>>, vector<64x64xbf16>
    %c657 = arith.constant 657 : index
    %c0_21 = arith.constant 0 : index
    %36 = vector.load %arg5[%c657, %c0_21] : memref<672x64xbf16, #tpu.memory_space<vmem>>, vector<1x64xbf16>
    %37 = arith.extf %36 : vector<1x64xbf16> to vector<1x64xf32>
    %38 = arith.truncf %34 : vector<8x64xf32> to vector<8x64xbf16>
    %cst_22 = arith.constant dense<0.000000e+00> : vector<8x64xf32>
    %39 = tpu.matmul %38, %35, %cst_22 {dimension_numbers = #tpu.dot_dimension_numbers<[1], [0], [0], [1], [0, 0, 1, 1], [], []>} : vector<8x64xbf16>, vector<64x64xbf16>, vector<8x64xf32> -> vector<8x64xf32>
    %40 = vector.broadcast %37 : vector<1x64xf32> to vector<8x64xf32>
    %41 = arith.addf %39, %40 : vector<8x64xf32>
    %cst_23 = arith.constant 0.000000e+00 : f32
    %42 = vector.broadcast %cst_23 : f32 to vector<8x64xf32>
    %43 = arith.maximumf %41, %42 : vector<8x64xf32>
    %c592 = arith.constant 592 : index
    %c0_24 = arith.constant 0 : index
    %44 = vector.load %arg5[%c592, %c0_24] : memref<672x64xbf16, #tpu.memory_space<vmem>>, vector<64x16xbf16>
    %c658 = arith.constant 658 : index
    %c0_25 = arith.constant 0 : index
    %45 = vector.load %arg5[%c658, %c0_25] : memref<672x64xbf16, #tpu.memory_space<vmem>>, vector<1x16xbf16>
    %46 = arith.extf %45 : vector<1x16xbf16> to vector<1x16xf32>
    %47 = arith.truncf %43 : vector<8x64xf32> to vector<8x64xbf16>
    %cst_26 = arith.constant dense<0.000000e+00> : vector<8x16xf32>
    %48 = tpu.matmul %47, %44, %cst_26 {dimension_numbers = #tpu.dot_dimension_numbers<[1], [0], [0], [1], [0, 0, 1, 1], [], []>} : vector<8x64xbf16>, vector<64x16xbf16>, vector<8x16xf32> -> vector<8x16xf32>
    %49 = vector.broadcast %46 : vector<1x16xf32> to vector<8x16xf32>
    %50 = arith.addf %48, %49 : vector<8x16xf32>
    %c0_27 = arith.constant 0 : index
    %c0_28 = arith.constant 0 : index
    %51 = vector.load %arg6[%c0_27, %c0_28] : memref<8x16xf32, #tpu.memory_space<vmem>>, vector<8x16xf32>
    tpu.vector_store %arg6[%c0_27, %c0_28], %50 {strides = array<i32>} : memref<8x16xf32, #tpu.memory_space<vmem>>, vector<8x16xf32>,
    return
  }
  func.func @transform_0(%arg0: i32) -> (i32, i32) {
    %c0_i32 = arith.constant 0 : i32
    %c0_i32_0 = arith.constant 0 : i32
    return %arg0, %c0_i32 : i32, i32
  }
  func.func @transform_1(%arg0: i32) -> (i32, i32) {
    %c0_i32 = arith.constant 0 : i32
    %c0_i32_0 = arith.constant 0 : i32
    return %arg0, %c0_i32 : i32, i32
  }
  func.func @transform_2(%arg0: i32) -> (i32, i32) {
    %c0_i32 = arith.constant 0 : i32
    %c0_i32_0 = arith.constant 0 : i32
    %c0_i32_1 = arith.constant 0 : i32
    return %c0_i32, %c0_i32_0 : i32, i32
  }
  func.func @transform_3(%arg0: i32) -> (i32, i32) {
    %c0_i32 = arith.constant 0 : i32
    %c0_i32_0 = arith.constant 0 : i32
    %c0_i32_1 = arith.constant 0 : i32
    return %c0_i32, %c0_i32_0 : i32, i32
  }
  func.func @transform_4(%arg0: i32) -> (i32, i32) {
    %c0_i32 = arith.constant 0 : i32
    %c0_i32_0 = arith.constant 0 : i32
    %c0_i32_1 = arith.constant 0 : i32
    return %c0_i32, %c0_i32_0 : i32, i32
  }
  func.func @transform_5(%arg0: i32) -> (i32, i32) {
    %c0_i32 = arith.constant 0 : i32
    %c0_i32_0 = arith.constant 0 : i32
    return %arg0, %c0_i32 : i32, i32
  }
}

</mosaic_0001>

<bundles_post_ra>
// kernel: bc3_ported_forward.1
= control target key start
LH: loop header
LB: loop body
LE: loop exit
PB: predicated region body
PF: predicated region fallthrough
CT: control target
= control target key end

     0   :  { %10 = vsyncpa [#allocation3], 0  ;;  %s1592_s18 = smov [#allocation2]   ;;  %s2007_s0 = inlined_call_operand.vmem [shape: f32[8,64], index: 0, kind: input, shape index: {}]   ;;  %s2008_s1 = inlined_call_operand.vmem [shape: f32[8,16], index: 1, kind: input, shape index: {}]   ;;  %s2009_s2 = inlined_call_operand.hbm [shape: bf16[80,256], index: 2, kind: input, shape index: {}]   ;;  %s2010_s3 = inlined_call_operand.vmem [shape: bf16[272,512], index: 3, kind: input, shape index: {}]   ;;  %s2011_s4 = inlined_call_operand.vmem [shape: bf16[672,64], index: 4, kind: input, shape index: {}]   ;;  %s2012_s5 = inlined_call_operand.vmem [shape: f32[8,16], index: 5, kind: output, shape index: {}]  }
   0x1   :  { %s20_s19 = sshll.u32 %s1592_s18, 4  ;;  %s1568_s22 = scalar_lea.hbm %s2009_s2, 1280  ;;  %s21_s19 = int_to_ptr.vmem [resolvable:$true] %s20_s19 }
   0x2   :  { %p1569_p0 = scmp.ne.s32.totalorder %s2009_s2, %s1568_s22  ;;  %p1572_p1 = scmp.lt.u32.totalorder %s1568_s22, %s2009_s2 }
   0x4   :  { %p1574_p2 = pnand %p1572_p1, %p1569_p0 }
   0x6   :  { %1577 = shalt.err (!%p1574_p2)
}
   0x7   :  { %s1578_s27 = scalar_lea.vmem %s21_s19, 1280  ;;  %p1583_p4 = scmp.lt.s32.totalorder %s21_s19, %s21_s19 }
   0x8   :  { %p1579_p3 = scmp.ne.s32.totalorder %s21_s19, %s1578_s27  ;;  %p1584_p5 = scmp.lt.s32.totalorder %s1578_s27, %s1578_s27 }
   0xa   :  { %p1585_p6 = por %p1584_p5, %p1583_p4 }
   0xc   :  { %p1586_p7 = pnand %p1585_p6, %p1579_p3 }
   0xe   :  { %1589 = shalt.err (!%p1586_p7)
}
   0xf   :  { %s1593_s28 = smov 128   ;;  %s1594_s29 = smov 8  }
  0x10   :  { %26 = dma.hbm_to_vmem [thread:$0]  %s2009_s2, 1280, %s21_s19, [#allocation3], %s1593_s28, %s1593_s28, %s1594_s29  }
  0x11   :  { %1590 = dma.done.wait [#allocation3], 1280  }
  0x12   :  { %1591 = vsyncadd [#allocation3], 4294966016  ;;  %v1595_v0 = vmov 0   ;;  %v1419_v1 = vld [vmem:[#allocation2 + $0x4] ss:$8 sps:$4 sm:$0xff]   ;;  %vm96_vm0 = vcmask 523264  }
  0x13   :  { %132 = vmatprep.mubr.bf16.mxu0 %v1595_v0  ;;  %v1421_v2 = vld [vmem:[#allocation2] ss:$8 sps:$4 sm:$0xff]   ;;  %100 = vmatprep.subr.bf16.mxu0 %v1419_v1  ;;  %v1422_v3 = vld [vmem:[#allocation2 + $0x14] ss:$8 sps:$4 sm:$0xff]   ;;  %v1424_v4 = vld [vmem:[#allocation2 + $0x10] ss:$8 sps:$4 sm:$0xff]  }
  0x14   :  { %101 = vmatpush1.bf16.msra.mxu0 %v1421_v2  ;;  %v1425_v5 = vld [vmem:[#allocation2 + $0x24] ss:$8 sps:$4 sm:$0xff]   ;;  %v1427_v7 = vld [vmem:[#allocation2 + $0x20] ss:$8 sps:$4 sm:$0xff]   ;;  %v1428_v8 = vld [vmem:[#allocation2 + $0x34] ss:$8 sps:$4 sm:$0xff]  }
  0x15   :  { %102 = vmatprep.subr.bf16.mxu0 %v1422_v3  ;;  %v1431_v6 = vld [vmem:[%s2010_s3 + $0x4] ss:$16 sps:$4 sm:$0xff]   ;;  %v1436_v9 = vld [vmem:[%s2010_s3] ss:$16 sps:$4 sm:$0xff]   ;;  %v1435_v15 = vld [vmem:[%s2010_s3 + $0xc] ss:$16 sps:$4 sm:$0xff]  }
  0x16   :  { %551 = vmatprep.subr.bf16.mxu1 %v1431_v6  ;;  %v1437_v10 = vld [vmem:[%s2010_s3 + $0x24] ss:$16 sps:$4 sm:$0xff]   ;;  %v1430_v11 = vld [vmem:[#allocation2 + $0x30] ss:$8 sps:$4 sm:$0xff]   ;;  %v1441_v20 = vld [vmem:[%s2010_s3 + $0x2c] ss:$16 sps:$4 sm:$0xff]  }
  0x17   :  { %v35_v12 = vld [vmem:[%s2007_s0] sm:$0xff]  ;;  %552 = vmatpush1.bf16.msra.mxu1 %v1436_v9  ;;  %v1433_v18 = vld [vmem:[%s2010_s3 + $0x8] ss:$16 sps:$4 sm:$0xff]   ;;  %v1447_v24 = vld [vmem:[%s2010_s3 + $0x4c] ss:$16 sps:$4 sm:$0xff]   ;;  %vm1597_vm1 = vmmov 0  }
  0x18   :  { %103 = vmatpush1.bf16.msra.mxu0 %v1424_v4  ;;  %v1442_v13 = vld [vmem:[%s2010_s3 + $0x20] ss:$16 sps:$4 sm:$0xff]   ;;  %553 = vmatprep.subr.bf16.mxu1 %v1437_v10  ;;  %v1443_v14 = vld [vmem:[%s2010_s3 + $0x44] ss:$16 sps:$4 sm:$0xff]   ;;  %v36_v16 = vpack.c.bf16 %v35_v12, %v35_v12  ;;  %v1439_v21 = vld [vmem:[%s2010_s3 + $0x28] ss:$16 sps:$4 sm:$0xff]  }
  0x19   :  { %104 = vmatprep.subr.bf16.mxu0 %v1425_v5  ;;  %v1448_v17 = vld [vmem:[%s2010_s3 + $0x40] ss:$16 sps:$4 sm:$0xff]   ;;  %v1449_v19 = vld [vmem:[%s2010_s3 + $0x64] ss:$16 sps:$4 sm:$0xff]   ;;  %v1445_v26 = vld [vmem:[%s2010_s3 + $0x48] ss:$16 sps:$4 sm:$0xff]  }
  0x1a   :  { %v1454_v22 = vld [vmem:[%s2010_s3 + $0x60] ss:$16 sps:$4 sm:$0xff]   ;;  %v1455_v23 = vld [vmem:[%s2010_s3 + $0x84] ss:$16 sps:$4 sm:$0xff]   ;;  %v1453_v28 = vld [vmem:[%s2010_s3 + $0x6c] ss:$16 sps:$4 sm:$0xff]  }
  0x1b   :  { %554 = vmatpush1.bf16.msra.mxu1 %v1442_v13  ;;  %v1460_v25 = vld [vmem:[%s2010_s3 + $0x80] ss:$16 sps:$4 sm:$0xff]   ;;  %v1461_v27 = vld [vmem:[%s2010_s3 + $0xa4] ss:$16 sps:$4 sm:$0xff]   ;;  %v1451_v29 = vld [vmem:[%s2010_s3 + $0x68] ss:$16 sps:$4 sm:$0xff]   ;;  %v48_v13 = vlaneseq }
  0x1c   :  { %105 = vmatpush1.bf16.msra.mxu0 %v1427_v7  ;;  %555 = vmatprep.subr.bf16.mxu1 %v1443_v14  ;;  %v1466_v30 = vld [vmem:[%s2010_s3 + $0xa0] ss:$16 sps:$4 sm:$0xff]   ;;  %v1467_v31 = vld [vmem:[%s2010_s3 + $0xc4] ss:$16 sps:$4 sm:$0xff]   ;;  %v1459_v32 = vld [vmem:[%s2010_s3 + $0x8c] ss:$16 sps:$4 sm:$0xff]  }
  0x1d   :  { %106 = vmatprep.subr.bf16.mxu0 %v1428_v8  ;;  %v1472_v33 = vld [vmem:[%s2010_s3 + $0xc0] ss:$16 sps:$4 sm:$0xff]   ;;  %v1457_v34 = vld [vmem:[%s2010_s3 + $0x88] ss:$16 sps:$4 sm:$0xff]   ;;  %v1473_v35 = vld [vmem:[%s2010_s3 + $0xe4] ss:$16 sps:$4 sm:$0xff]  }
  0x1e   :  { %v1465_v36 = vld [vmem:[%s2010_s3 + $0xac] ss:$16 sps:$4 sm:$0xff]   ;;  %v1463_v37 = vld [vmem:[%s2010_s3 + $0xa8] ss:$16 sps:$4 sm:$0xff]   ;;  %v1478_v38 = vld [vmem:[%s2010_s3 + $0xe0] ss:$16 sps:$4 sm:$0xff]  }
  0x1f   :  { %556 = vmatpush1.bf16.msra.mxu1 %v1448_v17  ;;  %v1479_v39 = vld [vmem:[%s2010_s3 + $0x104] ss:$16 sps:$4 sm:$0xff]   ;;  %v1471_v40 = vld [vmem:[%s2010_s3 + $0xcc] ss:$16 sps:$4 sm:$0xff]   ;;  %v1484_v41 = vld [vmem:[%s2010_s3 + $0x100] ss:$16 sps:$4 sm:$0xff]  }
  0x20   :  { %107 = vmatpush1.bf16.msra.mxu0 %v1430_v11  ;;  %557 = vmatprep.subr.bf16.mxu1 %v1449_v19  ;;  %v1469_v42 = vld [vmem:[%s2010_s3 + $0xc8] ss:$16 sps:$4 sm:$0xff]   ;;  %v1485_v43 = vld [vmem:[%s2010_s3 + $0x124] ss:$16 sps:$4 sm:$0xff]   ;;  %v1477_v44 = vld [vmem:[%s2010_s3 + $0xec] ss:$16 sps:$4 sm:$0xff]  }
  0x21   :  { %592 = vmatprep.subr.bf16.mxu0 %v1435_v15  ;;  %v1475_v45 = vld [vmem:[%s2010_s3 + $0xe8] ss:$16 sps:$4 sm:$0xff]   ;;  %v1483_v46 = vld [vmem:[%s2010_s3 + $0x10c] ss:$16 sps:$4 sm:$0xff]   ;;  %v1490_v47 = vld [vmem:[%s2010_s3 + $0x120] ss:$16 sps:$4 sm:$0xff]  }
  0x22   :  { %v1491_v48 = vld [vmem:[%s2010_s3 + $0x144] ss:$16 sps:$4 sm:$0xff]   ;;  %v1496_v49 = vld [vmem:[%s2010_s3 + $0x140] ss:$16 sps:$4 sm:$0xff]   ;;  %v1481_v50 = vld [vmem:[%s2010_s3 + $0x108] ss:$16 sps:$4 sm:$0xff]  }
  0x23   :  { %1218 = vmatmul.mubr.msk.bf16.vlgmr.msra.gmra.mrb[0].mxu0 %vm96_vm0, %v36_v16  ;;  %558 = vmatpush1.bf16.msra.mxu1 %v1454_v22  ;;  %v1497_v51 = vld [vmem:[%s2010_s3 + $0x164] ss:$16 sps:$4 sm:$0xff]   ;;  %v1489_v52 = vld [vmem:[%s2010_s3 + $0x12c] ss:$16 sps:$4 sm:$0xff]   ;;  %v1502_v53 = vld [vmem:[%s2010_s3 + $0x160] ss:$16 sps:$4 sm:$0xff]  }
  0x24   :  { %593 = vmatpush1.bf16.msra.mxu0 %v1433_v18  ;;  %559 = vmatprep.subr.bf16.mxu1 %v1455_v23  ;;  %v1487_v54 = vld [vmem:[%s2010_s3 + $0x128] ss:$16 sps:$4 sm:$0xff]   ;;  %v1503_v55 = vld [vmem:[%s2010_s3 + $0x184] ss:$16 sps:$4 sm:$0xff]   ;;  %v1495_v56 = vld [vmem:[%s2010_s3 + $0x14c] ss:$16 sps:$4 sm:$0xff]  }
  0x25   :  { %594 = vmatprep.subr.bf16.mxu0 %v1441_v20  ;;  %v1508_v57 = vld [vmem:[%s2010_s3 + $0x180] ss:$16 sps:$4 sm:$0xff]   ;;  %v1493_v58 = vld [vmem:[%s2010_s3 + $0x148] ss:$16 sps:$4 sm:$0xff]   ;;  %v1509_v59 = vld [vmem:[%s2010_s3 + $0x1a4] ss:$16 sps:$4 sm:$0xff]  }
  0x26   :  { %v1501_v60 = vld [vmem:[%s2010_s3 + $0x16c] ss:$16 sps:$4 sm:$0xff]   ;;  %v1514_v61 = vld [vmem:[%s2010_s3 + $0x1a0] ss:$16 sps:$4 sm:$0xff]   ;;  %v1499_v62 = vld [vmem:[%s2010_s3 + $0x168] ss:$16 sps:$4 sm:$0xff]  }
  0x27   :  { %560 = vmatpush1.bf16.msra.mxu1 %v1460_v25  ;;  %v1507_v63 = vld [vmem:[%s2010_s3 + $0x18c] ss:$16 sps:$4 sm:$0xff]   ;;  %v1505_v0 = vld [vmem:[%s2010_s3 + $0x188] ss:$16 sps:$4 sm:$0xff]   ;;  %v1515_v3 = vld [vmem:[%s2010_s3 + $0x1c4] ss:$16 sps:$4 sm:$0xff]  }
  0x28   :  { %595 = vmatpush1.bf16.msra.mxu0 %v1439_v21  ;;  %561 = vmatprep.subr.bf16.mxu1 %v1461_v27  ;;  %v1513_v1 = vld [vmem:[%s2010_s3 + $0x1ac] ss:$16 sps:$4 sm:$0xff]   ;;  %v1511_v2 = vld [vmem:[%s2010_s3 + $0x1a8] ss:$16 sps:$4 sm:$0xff]   ;;  %v1520_v6 = vld [vmem:[%s2010_s3 + $0x1c0] ss:$16 sps:$4 sm:$0xff]  }
  0x29   :  { %596 = vmatprep.subr.bf16.mxu0 %v1447_v24  ;;  %v1519_v4 = vld [vmem:[%s2010_s3 + $0x1cc] ss:$16 sps:$4 sm:$0xff]   ;;  %v1517_v5 = vld [vmem:[%s2010_s3 + $0x1c8] ss:$16 sps:$4 sm:$0xff]   ;;  %v1521_v7 = vld [vmem:[%s2010_s3 + $0x1e4] ss:$16 sps:$4 sm:$0xff]  }
  0x2a   :  { %v1525_v8 = vld [vmem:[%s2010_s3 + $0x1ec] ss:$16 sps:$4 sm:$0xff]   ;;  %v1523_v9 = vld [vmem:[%s2010_s3 + $0x1e8] ss:$16 sps:$4 sm:$0xff]   ;;  %v1526_v10 = vld [vmem:[%s2010_s3 + $0x1e0] ss:$16 sps:$4 sm:$0xff]  }
  0x2b   :  { %562 = vmatpush1.bf16.msra.mxu1 %v1466_v30  ;;  %v1527_v11 = vld [vmem:[%s2011_s4 + $0x40] sm:$0xff]   ;;  %v1842_v14 = vshrl.u32 %v48_v13, 7  ;;  %vm990_vm2 = vcmask 130048  }
  0x2c   :  { %597 = vmatpush1.bf16.msra.mxu0 %v1445_v26  ;;  %563 = vmatprep.subr.bf16.mxu1 %v1467_v31  ;;  %v1529_v12 = vld [vmem:[%s2011_s4 + $0xc0] sm:$0xff]  }
  0x2d   :  { %598 = vmatprep.subr.bf16.mxu0 %v1453_v28  ;;  %v45_v15 = vld [vmem:[#allocation2 + $0x40] sm:$0x11]  ;;  %v1845_v17 = vsub.s32 0, %v1842_v14 }
  0x2e   :  { %v46_v16 = vunpack.c.l.bf16 %v45_v15  ;;  %v47_v18 = vunpack.c.h.bf16 %v45_v15  ;;  %v1528_v30 = vld [vmem:[%s2011_s4] sm:$0xff]  }
  0x2f   :  { %564 = vmatpush1.bf16.msra.mxu1 %v1472_v33  ;;  %v1530_v31 = vld [vmem:[%s2011_s4 + $0x80] sm:$0xff]   ;;  %v1531_v33 = vld [vmem:[%s2011_s4 + $0x48] sm:$0xff]  }
  0x30   :  { %599 = vmatpush1.bf16.msra.mxu0 %v1451_v29  ;;  %565 = vmatprep.subr.bf16.mxu1 %v1473_v35  ;;  %v51_v19 = vrot.slane %v46_v16, %v1845_v17  ;;  %v55_v20 = vrot.slane %v47_v18, %v1845_v17  ;;  %v1532_v35 = vld [vmem:[%s2011_s4 + $0x8] sm:$0xff]  }
  0x31   :  { %600 = vmatprep.subr.bf16.mxu0 %v1459_v32 }
  0x33   :  { %566 = vmatpush1.bf16.msra.mxu1 %v1478_v38  ;;  %v1537_v38 = vld [vmem:[%s2011_s4 + $0xd0] sm:$0xff]  }
  0x34   :  { %601 = vmatpush1.bf16.msra.mxu0 %v1457_v34  ;;  %567 = vmatprep.subr.bf16.mxu1 %v1479_v39  ;;  %v1533_v34 = vld [vmem:[%s2011_s4 + $0xc8] sm:$0xff]   ;;  %v1536_v39 = vld [vmem:[%s2011_s4 + $0x10] sm:$0xff]  }
  0x35   :  { %602 = vmatprep.subr.bf16.mxu0 %v1465_v36  ;;  %v1534_v36 = vld [vmem:[%s2011_s4 + $0x88] sm:$0xff]  }
  0x37   :  { %568 = vmatpush1.bf16.msra.mxu1 %v1484_v41  ;;  %v1539_v41 = vld [vmem:[%s2011_s4 + $0x58] sm:$0xff]  }
  0x38   :  { %603 = vmatpush1.bf16.msra.mxu0 %v1463_v37  ;;  %569 = vmatprep.subr.bf16.mxu1 %v1485_v43  ;;  %v1535_v37 = vld [vmem:[%s2011_s4 + $0x50] sm:$0xff]   ;;  %v1540_v43 = vld [vmem:[%s2011_s4 + $0x18] sm:$0xff]  }
  0x39   :  { %604 = vmatprep.subr.bf16.mxu0 %v1471_v40  ;;  %v1538_v40 = vld [vmem:[%s2011_s4 + $0x90] sm:$0xff]  }
  0x3b   :  { %570 = vmatpush1.bf16.msra.mxu1 %v1490_v47  ;;  %v1544_v47 = vld [vmem:[%s2011_s4 + $0x20] sm:$0xff]  }
  0x3c   :  { %605 = vmatpush1.bf16.msra.mxu0 %v1469_v42  ;;  %571 = vmatprep.subr.bf16.mxu1 %v1491_v48  ;;  %v1541_v42 = vld [vmem:[%s2011_s4 + $0xd8] sm:$0xff]   ;;  %v1546_v48 = vld [vmem:[%s2011_s4 + $0xa0] sm:$0xff]  }
  0x3d   :  { %606 = vmatprep.subr.bf16.mxu0 %v1477_v44  ;;  %v1542_v44 = vld [vmem:[%s2011_s4 + $0x98] sm:$0xff]  }
  0x3f   :  { %572 = vmatpush1.bf16.msra.mxu1 %v1496_v49  ;;  %v1547_v49 = vld [vmem:[%s2011_s4 + $0x68] sm:$0xff]  }
  0x40   :  { %607 = vmatpush1.bf16.msra.mxu0 %v1475_v45  ;;  %573 = vmatprep.subr.bf16.mxu1 %v1497_v51  ;;  %v1543_v45 = vld [vmem:[%s2011_s4 + $0x60] sm:$0xff]   ;;  %v1548_v51 = vld [vmem:[%s2011_s4 + $0x28] sm:$0xff]  }
  0x41   :  { %608 = vmatprep.subr.bf16.mxu0 %v1483_v46  ;;  %v1545_v46 = vld [vmem:[%s2011_s4 + $0xe0] sm:$0xff]  }
  0x43   :  { %574 = vmatpush1.bf16.msra.mxu1 %v1502_v53  ;;  %v1551_v53 = vld [vmem:[%s2011_s4 + $0x70] sm:$0xff]  }
  0x44   :  { %609 = vmatpush1.bf16.msra.mxu0 %v1481_v50  ;;  %575 = vmatprep.subr.bf16.mxu1 %v1503_v55  ;;  %v1549_v50 = vld [vmem:[%s2011_s4 + $0xe8] sm:$0xff]   ;;  %v1552_v55 = vld [vmem:[%s2011_s4 + $0x30] sm:$0xff]  }
  0x45   :  { %610 = vmatprep.subr.bf16.mxu0 %v1489_v52  ;;  %v1550_v52 = vld [vmem:[%s2011_s4 + $0xa8] sm:$0xff]  }
  0x47   :  { %576 = vmatpush1.bf16.msra.mxu1 %v1508_v57  ;;  %v1555_v57 = vld [vmem:[%s2011_s4 + $0x78] sm:$0xff]  }
  0x48   :  { %611 = vmatpush1.bf16.msra.mxu0 %v1487_v54  ;;  %577 = vmatprep.subr.bf16.mxu1 %v1509_v59  ;;  %v1553_v54 = vld [vmem:[%s2011_s4 + $0xf0] sm:$0xff]   ;;  %v1556_v59 = vld [vmem:[%s2011_s4 + $0x38] sm:$0xff]  }
  0x49   :  { %612 = vmatprep.subr.bf16.mxu0 %v1495_v56  ;;  %v1554_v56 = vld [vmem:[%s2011_s4 + $0xb0] sm:$0xff]  }
  0x4b   :  { %578 = vmatpush1.bf16.msra.mxu1 %v1514_v61  ;;  %v1596_v61 = vmov 0.0  }
  0x4c   :  { %613 = vmatpush1.bf16.msra.mxu0 %v1493_v58  ;;  %579 = vmatprep.subr.bf16.mxu1 %v1515_v3  ;;  %v1557_v58 = vld [vmem:[%s2011_s4 + $0xf8] sm:$0xff]  }
  0x4d   :  { %614 = vmatprep.subr.bf16.mxu0 %v1501_v60  ;;  %v1558_v60 = vld [vmem:[%s2011_s4 + $0xb8] sm:$0xff]  }
  0x4f   :  { %580 = vmatpush1.bf16.msra.mxu1 %v1520_v6 }
  0x50   :  { %615 = vmatpush1.bf16.msra.mxu0 %v1499_v62  ;;  %581 = vmatprep.subr.bf16.mxu1 %v1521_v7  ;;  %v207_v62 = vld [vmem:[%s2010_s3 + $0x200] sm:$0x11] }
  0x51   :  { %616 = vmatprep.subr.bf16.mxu0 %v1507_v63  ;;  %v208_v63 = vld [vmem:[%s2010_s3 + $0x208] sm:$0x11] }
  0x52   :  { %v212_v3 = vunpack.c.h.bf16 %v208_v63 }
  0x53   :  { %582 = vmatpush1.bf16.msra.mxu1 %v1526_v10 }
  0x54   :  { %617 = vmatpush1.bf16.msra.mxu0 %v1505_v0  ;;  %1327 = vmatprep.subr.bf16.mxu1 %v1527_v11  ;;  %v209_v0 = vunpack.c.l.bf16 %v207_v62  ;;  %v230_v7 = vrot.slane %v212_v3, %v1845_v17 }
  0x55   :  { %618 = vmatprep.subr.bf16.mxu0 %v1513_v1  ;;  %v211_v1 = vunpack.c.l.bf16 %v208_v63  ;;  %v1566_v63 = vld [vmem:[%s2011_s4 + $0x138] sm:$0xff]  }
  0x58   :  { %619 = vmatpush1.bf16.msra.mxu0 %v1511_v2  ;;  %v210_v2 = vunpack.c.h.bf16 %v207_v62 }
  0x59   :  { %620 = vmatprep.subr.bf16.mxu0 %v1519_v4  ;;  %v218_v4 = vrot.slane %v209_v0, %v1845_v17  ;;  %v1052_v0 = vsub.s32 1, %v1842_v14 }
  0x5a   :  { %v222_v6 = vrot.slane %v210_v2, %v1845_v17 }
  0x5c   :  { %621 = vmatpush1.bf16.msra.mxu0 %v1517_v5  ;;  %v226_v5 = vrot.slane %v211_v1, %v1845_v17 }
  0x5d   :  { %622 = vmatprep.subr.bf16.mxu0 %v1525_v8 }
  0x60   :  { %623 = vmatpush1.bf16.msra.mxu0 %v1523_v9 }
  0x61   :  { %1349 = vmatprep.subr.bf16.mxu0 %v1529_v12 }
  0xf6   :  { %v134_v21 = vpop.f32.mrb[0].mxu0 }
  0xf7   :  { %v135_v22 = vadd.f32 %v134_v21, %v51_v19  ;;  %v136_v23 = vpop.f32.mrb[1].mxu0 }
  0xf8   :  { %v137_v24 = vadd.f32 %v136_v23, %v55_v20  ;;  %v138_v25 = vpop.f32.mrb[2].mxu0 }
  0xf9   :  { %v141_v26 = vmax.f32 %v135_v22, 0.0  ;;  %v139_v27 = vpop.f32.mrb[3].mxu0 }
  0xfa   :  { %v142_v28 = vmax.f32 %v137_v24, 0.0 }
  0xfb   :  { %v213_v32 = vpack.c.bf16 %v141_v26, %v141_v26 }
  0xfc   :  { %v214_v29 = vpack.c.bf16 %v142_v28, %v142_v28  ;;  %v1559_v28 = vld [vmem:[%s2011_s4 + $0x100] sm:$0xff]  }
  0xfe   :  { %583 = vmatprep.mubr.bf16.mxu1 %v214_v29  ;;  %624 = vmatprep.mubr.bf16.mxu0 %v214_v29 }
  0xff   :  { %584 = vmatmul.mubr.bf16.vlgmr.msra.gmra.mrb[0].mxu1 %v213_v32  ;;  %625 = vmatmul.mubr.bf16.vlgmr.msra.gmra.mrb[4].mxu0 %v213_v32 }
 0x100   :  { %1328 = vmatpush3.bf16.msra.mxu1 %v1528_v30  ;;  %1350 = vmatpush3.bf16.msra.mxu0 %v1530_v31  ;;  %v637_v31 = vld [vmem:[%s2008_s1] sm:$0xff] }
 0x101   :  { %1329 = vmatprep.subr.bf16.mxu1 %v1531_v33  ;;  %1351 = vmatprep.subr.bf16.mxu0 %v1533_v34  ;;  %v638_v32 = vpack.c.bf16 %v637_v31, %v637_v31  ;;  %v1560_v33 = vld [vmem:[%s2011_s4 + $0x108] sm:$0xff]   ;;  %v1561_v34 = vld [vmem:[%s2011_s4 + $0x110] sm:$0xff]  }
 0x104   :  { %1330 = vmatpush3.bf16.msra.mxu1 %v1532_v35  ;;  %1352 = vmatpush3.bf16.msra.mxu0 %v1534_v36  ;;  %v1562_v35 = vld [vmem:[%s2011_s4 + $0x118] sm:$0xff]   ;;  %v1563_v36 = vld [vmem:[%s2011_s4 + $0x120] sm:$0xff]  }
 0x105   :  { %1331 = vmatprep.subr.bf16.mxu1 %v1535_v37  ;;  %1353 = vmatprep.subr.bf16.mxu0 %v1537_v38  ;;  %v1564_v37 = vld [vmem:[%s2011_s4 + $0x128] sm:$0xff]   ;;  %v1565_v38 = vld [vmem:[%s2011_s4 + $0x130] sm:$0xff]  }
 0x108   :  { %1332 = vmatpush3.bf16.msra.mxu1 %v1536_v39  ;;  %1354 = vmatpush3.bf16.msra.mxu0 %v1538_v40 }
 0x109   :  { %1333 = vmatprep.subr.bf16.mxu1 %v1539_v41  ;;  %1355 = vmatprep.subr.bf16.mxu0 %v1541_v42  ;;  %v705_v41 = vld [vmem:[%s2011_s4 + $0x148] sm:$0x1] }
 0x10c   :  { %1334 = vmatpush3.bf16.msra.mxu1 %v1540_v43  ;;  %1356 = vmatpush3.bf16.msra.mxu0 %v1542_v44 }
 0x10d   :  { %1335 = vmatprep.subr.bf16.mxu1 %v1543_v45  ;;  %1357 = vmatprep.subr.bf16.mxu0 %v1545_v46 }
 0x110   :  { %1336 = vmatpush3.bf16.msra.mxu1 %v1544_v47  ;;  %1358 = vmatpush3.bf16.msra.mxu0 %v1546_v48 }
 0x111   :  { %1337 = vmatprep.subr.bf16.mxu1 %v1547_v49  ;;  %1359 = vmatprep.subr.bf16.mxu0 %v1549_v50  ;;  %v706_v50 = vunpack.c.l.bf16 %v705_v41 }
 0x113   :  { %v1053_v1 = vrot.slane %v706_v50, %v1052_v0 }
 0x114   :  { %1338 = vmatpush3.bf16.msra.mxu1 %v1548_v51  ;;  %1360 = vmatpush3.bf16.msra.mxu0 %v1550_v52 }
 0x115   :  { %1339 = vmatprep.subr.bf16.mxu1 %v1551_v53  ;;  %1361 = vmatprep.subr.bf16.mxu0 %v1553_v54  ;;  %v1038_v53 = vrot.slane %v706_v50, %v1845_v17  ;;  %v1567_v17 = vld [vmem:[%s2011_s4 + $0x140] sm:$0xff]  }
 0x118   :  { %1340 = vmatpush3.bf16.msra.mxu1 %v1552_v55  ;;  %1362 = vmatpush3.bf16.msra.mxu0 %v1554_v56 }
 0x119   :  { %1341 = vmatprep.subr.bf16.mxu1 %v1555_v57  ;;  %1363 = vmatprep.subr.bf16.mxu0 %v1557_v58 }
 0x11c   :  { %1342 = vmatpush3.bf16.msra.mxu1 %v1556_v59  ;;  %1364 = vmatpush3.bf16.msra.mxu0 %v1558_v60 }
 0x11d   :  { %1383 = vmatprep.subr.bf16.mxu1 %v1596_v61  ;;  %1401 = vmatprep.subr.bf16.mxu0 %v1596_v61 }
 0x1d2   :  { %v585_v8 = vpop.f32.mrb[0].mxu1  ;;  %v626_v9 = vpop.f32.mrb[4].mxu0 }
 0x1d3   :  { %v586_v10 = vadd.f32 %v585_v8, %v218_v4  ;;  %v627_v11 = vadd.f32 %v626_v9, %v226_v5  ;;  %v587_v12 = vpop.f32.mrb[1].mxu1  ;;  %v628_v13 = vpop.f32.mrb[5].mxu0 }
 0x1d4   :  { %v588_v15 = vadd.f32 %v587_v12, %v222_v6  ;;  %v629_v16 = vadd.f32 %v628_v13, %v230_v7  ;;  %v589_v18 = vpop.f32.mrb[2].mxu1  ;;  %v630_v19 = vpop.f32.mrb[6].mxu0 }
 0x1d5   :  { %v633_v20 = vmax.f32 %v586_v10, 0.0  ;;  %v635_v21 = vmax.f32 %v627_v11, 0.0  ;;  %v590_v22 = vpop.f32.mrb[3].mxu1  ;;  %v631_v23 = vpop.f32.mrb[7].mxu0  ;;  %v1135_v10 = vsub.s32 2, %v1842_v14 }
 0x1d6   :  { %v634_v24 = vmax.f32 %v588_v15, 0.0  ;;  %v636_v25 = vmax.f32 %v629_v16, 0.0 }
 0x1d7   :  { %v707_v29 = vpack.c.bf16 %v633_v20, %v633_v20  ;;  %v709_v30 = vpack.c.bf16 %v635_v21, %v635_v21 }
 0x1d8   :  { %v708_v26 = vpack.c.bf16 %v634_v24, %v634_v24  ;;  %v710_v27 = vpack.c.bf16 %v636_v25, %v636_v25 }
 0x1da   :  { %935 = vmatprep.mubr.bf16.mxu1 %v708_v26  ;;  %975 = vmatprep.mubr.bf16.mxu0 %v710_v27 }
 0x1db   :  { %936 = vmatmul.mubr.bf16.vlgmr.msra.gmra.mrb[4].mxu1 %v707_v29  ;;  %976 = vmatmul.mubr.bf16.vlgmr.msra.gmra.mrb[8].mxu0 %v709_v30 }
 0x1dc   :  { %1384 = vmatpush3.bf16.msra.mxu1 %v1559_v28  ;;  %1385 = vmatprep.mubr.msk.bf16.mxu1 %vm1597_vm1, %v1596_v61 }
 0x1dd   :  { %1389 = vmatprep.subr.bf16.mxu1 %v1596_v61  ;;  %1409 = vmatprep.mubr.msk.bf16.mxu0 %vm1597_vm1, %v1596_v61 }
 0x1de   :  { %1402 = vmatpush3.bf16.msra.mxu0 %v1564_v37 }
 0x1df   :  { %1403 = vmatprep.subr.bf16.mxu0 %v1596_v61 }
 0x1e2   :  { %1404 = vmatpush3.bf16.msra.mxu0 %v1565_v38 }
 0x1e3   :  { %1386 = vmatmul.mubr.msk.bf16.vlgmr.msra.gmra.mrb[8].mxu1 %vm990_vm2, %v638_v32  ;;  %1405 = vmatprep.subr.bf16.mxu0 %v1596_v61 }
 0x1e4   :  { %1397 = vmatprep.mubr.msk.bf16.mxu1 %vm1597_vm1, %v1596_v61  ;;  %1390 = vmatpush3.bf16.msra.mxu1 %v1560_v33 }
 0x1e5   :  { %1391 = vmatprep.subr.bf16.mxu1 %v1596_v61 }
 0x1e6   :  { %1406 = vmatpush3.bf16.msra.mxu0 %v1566_v63 }
 0x1e7   :  { %1407 = vmatprep.subr.bf16.mxu0 %v1596_v61 }
 0x1e8   :  { %1392 = vmatpush3.bf16.msra.mxu1 %v1561_v34 }
 0x1e9   :  { %1393 = vmatprep.subr.bf16.mxu1 %v1596_v61 }
 0x1ea   :  { %1408 = vmatpush3.bf16.msra.mxu0 %v1567_v17 }
 0x1ec   :  { %1394 = vmatpush3.bf16.msra.mxu1 %v1562_v35 }
 0x1ed   :  { %1395 = vmatprep.subr.bf16.mxu1 %v1596_v61  ;;  %v1130_v61 = vld [vmem:[%s2011_s4 + $0x148] sm:$0x2] }
 0x1ee   :  { %v1131_v9 = vunpack.c.l.bf16 %v1130_v61 }
 0x1f0   :  { %1396 = vmatpush3.bf16.msra.mxu1 %v1563_v36  ;;  %v1136_v11 = vrot.slane %v1131_v9, %v1135_v10 }
 0x2ae   :  { %v1343_v39 = vpop.f32.mrb[4].mxu1  ;;  %v1365_v40 = vpop.f32.mrb[8].mxu0 }
 0x2af   :  { %v1344_v42 = vpop.f32.mrb[5].mxu1  ;;  %v1366_v43 = vpop.f32.mrb[9].mxu0 }
 0x2b0   :  { %v1345_v44 = vadd.f32 %v1344_v42, %v1343_v39  ;;  %v1367_v45 = vadd.f32 %v1366_v43, %v1365_v40  ;;  %v1346_v46 = vpop.f32.mrb[6].mxu1  ;;  %v1368_v47 = vpop.f32.mrb[10].mxu0 }
 0x2b1   :  { %v1347_v48 = vpop.f32.mrb[7].mxu1  ;;  %v1369_v49 = vpop.f32.mrb[11].mxu0 }
 0x2b2   :  { %v978_v51 = vadd.f32 %v1367_v45, %v1345_v44 }
 0x2b4   :  { %v983_v52 = vmul.f32 0.033333335, %v978_v51 }
 0x2b6   :  { %v1028_v54 = vpop.f32.mrb[8].mxu1 }
 0x2b7   :  { %v1034_v55 = vadd.f32 %v1028_v54, %v983_v52  ;;  %v1387_v56 = vpop.f32.mrb[9].mxu1 }
 0x2b8   :  { %v1031_v57 = vpop.f32.mrb[10].mxu1 }
 0x2b9   :  { %v1039_v58 = vadd.f32 %v1038_v53, %v1034_v55  ;;  %v1388_v59 = vpop.f32.mrb[11].mxu1 }
 0x2bb   :  { %v1040_v60 = vmax.f32 %v1039_v58, 0.0 }
 0x2bd   :  { %v1049_v62 = vpack.c.bf16 %v1040_v60, %v1040_v60 }
 0x2bf   :  { %1398 = vmatmul.mubr.msk.bf16.vlgmr.msra.gmra.mrb[12].mxu1 %vm96_vm0, %v1049_v62 }
 0x392   :  { %v1115_v2 = vpop.f32.mrb[12].mxu1 }
 0x393   :  { %v1116_v3 = vadd.f32 %v1115_v2, %v1053_v1  ;;  %v1399_v4 = vpop.f32.mrb[13].mxu1 }
 0x394   :  { %v1118_v5 = vpop.f32.mrb[14].mxu1 }
 0x395   :  { %v1121_v6 = vmax.f32 %v1116_v3, 0.0  ;;  %v1400_v7 = vpop.f32.mrb[15].mxu1 }
 0x397   :  { %v1132_v8 = vpack.c.bf16 %v1121_v6, %v1121_v6 }
 0x399   :  { %1410 = vmatmul.mubr.msk.bf16.vlgmr.msra.gmra.mrb[12].mxu0 %vm96_vm0, %v1132_v8 }
 0x46c   :  { %v1198_v12 = vpop.f32.mrb[12].mxu0 }
 0x46d   :  { %v1199_v13 = vadd.f32 %v1198_v12, %v1136_v11  ;;  %v1411_v15 = vpop.f32.mrb[13].mxu0 }
 0x46e   :  { %v1201_v16 = vpop.f32.mrb[14].mxu0 }
 0x46f   :  { %1204 = vst.msk [vmem:[%s2012_s5] sm:$0xff] %vm990_vm2, %v1199_v13  ;;  %v1412_v18 = vpop.f32.mrb[15].mxu0 }
 0x470   :  { %1209 = vsyncpa [#allocation3], 1 }

</bundles_post_ra>
